<compile_context>
chip_gen: v6e
topology: v6e:2x2x1
jax: 0.10.0
libtpu: 0.0.40
codegen_flags: <defaults>
</compile_context>

<pallas_src>
import jax
import jax.numpy as jnp
from jax.experimental import pallas as pl
from jax.experimental.pallas import tpu as pltpu

LEAK = 0.2
EPS = 1e-5
ACT_DTYPE = jnp.bfloat16            # inter-layer activations / matmul operands
VMEM_LIMIT = 32 * 1024 * 1024       # <= physical VMEM on v5e / v6e / v7x


# ----------------------------- Pallas kernels ------------------------------

def _conv_lrelu_kernel(p_ref, w_ref, o_ref):
    # (TILE_M, K) @ (K, Cout): f32 accumulate, LeakyReLU(0.2), bf16 store.
    y = jnp.dot(p_ref[...], w_ref[...], preferred_element_type=jnp.float32)
    o_ref[...] = jnp.where(y > 0, y, LEAK * y).astype(o_ref.dtype)


def _conv_bn_lrelu_kernel(p_ref, w_ref, g_ref, b_ref, o_ref):
    # conv-as-matmul + BatchNorm2d (batch stats, biased var) + LeakyReLU(0.2).
    y = jnp.dot(p_ref[...], w_ref[...], preferred_element_type=jnp.float32)
    inv_m = 1.0 / y.shape[0]
    s1 = jnp.sum(y, axis=0, keepdims=True)              # single pass over rows
    s2 = jnp.sum(y * y, axis=0, keepdims=True)
    mean = s1 * inv_m
    var = jnp.maximum(s2 * inv_m - mean * mean, 0.0)
    scale = jax.lax.rsqrt(var + EPS) * g_ref[...]        # per column (1, Cout)
    shift = b_ref[...] - mean * scale
    yn = y * scale + shift                               # pure VPU mul/add
    o_ref[...] = jnp.where(yn > 0, yn, LEAK * yn).astype(o_ref.dtype)


def _conv_bn_lrelu_fc_kernel(p_ref, w_ref, g_ref, b_ref, fw_ref, fb_ref, o_ref):
    # conv4 (1x1 spatial) + BN + LeakyReLU + Linear, fused in one kernel.
    y = jnp.dot(p_ref[...], w_ref[...], preferred_element_type=jnp.float32)
    inv_m = 1.0 / y.shape[0]
    s1 = jnp.sum(y, axis=0, keepdims=True)
    s2 = jnp.sum(y * y, axis=0, keepdims=True)
    mean = s1 * inv_m
    var = jnp.maximum(s2 * inv_m - mean * mean, 0.0)
    scale = jax.lax.rsqrt(var + EPS) * g_ref[...]
    shift = b_ref[...] - mean * scale
    yn = y * scale + shift
    h = jnp.where(yn > 0, yn, LEAK * yn)
    o_ref[...] = (jnp.dot(h.astype(fw_ref.dtype), fw_ref[...],
                          preferred_element_type=jnp.float32) + fb_ref[...])


# ------------------------------ JAX glue ------------------------------------

def _full_spec(shape):
    # whole-array block (no grid)
    return pl.BlockSpec(shape, lambda: (0,) * len(shape))


def _pick_tile_m(m):
    # largest row tile that evenly divides M (big tiles amortize per-step cost)
    for t in (4096, 2048, 1024, 512, 256, 128):
        if m % t == 0:
            return t
    return m


def _im2col_nhwc(x_nhwc, k=4, s=2, p=1):
    """4x4 / stride-2 / pad-1 patches of an NHWC tensor -> (N*Ho*Wo, kh*kw*C).

    Column order is (kh, kw, Cin) to match weights flattened as
    (kh, kw, Cin, Cout); only pad + strided slices + a lane-axis concat, no
    transposes."""
    N, H, W, C = x_nhwc.shape
    xp = jnp.pad(x_nhwc, ((0, 0), (p, p), (p, p), (0, 0)))
    Ho = (H + 2 * p - k) // s + 1
    Wo = (W + 2 * p - k) // s + 1
    cols = [xp[:, i:i + s * Ho:s, j:j + s * Wo:s, :]
            for i in range(k) for j in range(k)]
    pat = jnp.concatenate(cols, axis=-1)                 # (N, Ho, Wo, k*k*C)
    return pat.reshape(N * Ho * Wo, k * k * C), Ho, Wo


def _conv_weight_matrix(w_oihw):
    # PyTorch (Cout, Cin, kh, kw) -> (kh*kw*Cin, Cout) in bf16 (MXU operand).
    cout = w_oihw.shape[0]
    return (jnp.transpose(w_oihw, (2, 3, 1, 0))
            .reshape(-1, cout).astype(ACT_DTYPE))


def conv_lrelu(x_nhwc, w_oihw):
    """conv1 + LeakyReLU: rows are independent -> tiled, 'parallel' grid."""
    N = x_nhwc.shape[0]
    cout = w_oihw.shape[0]
    pat, ho, wo = _im2col_nhwc(x_nhwc)
    wm = _conv_weight_matrix(w_oihw)
    M, K = pat.shape
    tm = _pick_tile_m(M)
    out = pl.pallas_call(
        _conv_lrelu_kernel,
        out_shape=jax.ShapeDtypeStruct((M, cout), ACT_DTYPE),
        grid=(M // tm,),
        in_specs=[pl.BlockSpec((tm, K), lambda i: (i, 0)),
                  pl.BlockSpec((K, cout), lambda i: (0, 0))],
        out_specs=pl.BlockSpec((tm, cout), lambda i: (i, 0)),
        compiler_params=pltpu.CompilerParams(
            dimension_semantics=("parallel",),
            vmem_limit_bytes=VMEM_LIMIT),
        cost_estimate=pl.CostEstimate(
            flops=2 * M * K * cout,
            transcendentals=0,
            bytes_accessed=(M * K + K * cout + M * cout) * 2),
    )(pat, wm)
    return out.reshape(N, ho, wo, cout)


def conv_bn_lrelu(x_nhwc, w_oihw, gamma, beta):
    """conv + BatchNorm (batch stats) + LeakyReLU, whole-array kernel.

    # TODO(synk): tiling M past VMEM would require a two-phase cross-tile
    # BN reduction (accumulate sum/sumsq, then normalize); kept whole-array
    # here so batch statistics stay exact — fine at MNIST / encoder scale."""
    N = x_nhwc.shape[0]
    cout = w_oihw.shape[0]
    pat, ho, wo = _im2col_nhwc(x_nhwc)
    wm = _conv_weight_matrix(w_oihw)
    M, K = pat.shape
    out = pl.pallas_call(
        _conv_bn_lrelu_kernel,
        out_shape=jax.ShapeDtypeStruct((M, cout), ACT_DTYPE),
        in_specs=[_full_spec((M, K)), _full_spec((K, cout)),
                  _full_spec((1, cout)), _full_spec((1, cout))],
        out_specs=_full_spec((M, cout)),
        compiler_params=pltpu.CompilerParams(vmem_limit_bytes=VMEM_LIMIT),
        cost_estimate=pl.CostEstimate(
            flops=2 * M * K * cout + 8 * M * cout,
            transcendentals=cout,
            bytes_accessed=(M * K + K * cout + M * cout) * 2 + 2 * cout * 4),
    )(pat, wm,
      gamma.reshape(1, cout).astype(jnp.float32),
      beta.reshape(1, cout).astype(jnp.float32))
    return out.reshape(N, ho, wo, cout)


def conv_bn_lrelu_fc(x_nhwc, w_oihw, gamma, beta, fc_w, fc_b):
    """conv4 (1x1 spatial output) + BN + LeakyReLU + fc fused in one kernel."""
    cout = w_oihw.shape[0]
    nz = fc_w.shape[0]
    pat, ho, wo = _im2col_nhwc(x_nhwc)                   # spatial 1x1 -> M == N
    wm = _conv_weight_matrix(w_oihw)
    M, K = pat.shape
    fwm = fc_w.T.astype(ACT_DTYPE)                       # (cout, nz)
    out = pl.pallas_call(
        _conv_bn_lrelu_fc_kernel,
        out_shape=jax.ShapeDtypeStruct((M, nz), jnp.float32),
        in_specs=[_full_spec((M, K)), _full_spec((K, cout)),
                  _full_spec((1, cout)), _full_spec((1, cout)),
                  _full_spec((cout, nz)), _full_spec((1, nz))],
        out_specs=_full_spec((M, nz)),
        compiler_params=pltpu.CompilerParams(vmem_limit_bytes=VMEM_LIMIT),
        cost_estimate=pl.CostEstimate(
            flops=2 * M * K * cout + 2 * M * cout * nz + 8 * M * cout,
            transcendentals=cout,
            bytes_accessed=(M * K + K * cout + cout * nz) * 2 + M * nz * 4),
    )(pat, wm,
      gamma.reshape(1, cout).astype(jnp.float32),
      beta.reshape(1, cout).astype(jnp.float32),
      fwm, fc_b.reshape(1, nz).astype(jnp.float32))
    return out


def encoder_forward(x_nchw, params):
    # One-time NCHW -> lane-dense NHWC (+ bf16) at the boundary; all further
    # layers stay in (N*H*W, C) matmul layout with channels on the lane axis.
    x = jnp.transpose(x_nchw, (0, 2, 3, 1)).astype(ACT_DTYPE)
    x = conv_lrelu(x, params["w1"])                                    # conv1 + LReLU
    x = conv_bn_lrelu(x, params["w2"], params["g2"], params["b2"])     # conv2 + BN + LReLU
    x = conv_bn_lrelu(x, params["w3"], params["g3"], params["b3"])     # conv3 + BN + LReLU
    # conv4 output is 1x1 spatial; x.squeeze() == (N, dim_h*8); fc fused in.
    return conv_bn_lrelu_fc(x, params["w4"], params["g4"], params["b4"],
                            params["fc_w"], params["fc_b"])


# ------------------------------- main ----------------------------------------

def make_params(key, n_channel, dim_h, n_z):
    ks = jax.random.split(key, 6)
    p = {}
    p["w1"] = 0.1 * jax.random.normal(ks[0], (dim_h, n_channel, 4, 4), jnp.float32)
    p["w2"] = 0.1 * jax.random.normal(ks[1], (dim_h * 2, dim_h, 4, 4), jnp.float32)
    p["w3"] = 0.1 * jax.random.normal(ks[2], (dim_h * 4, dim_h * 2, 4, 4), jnp.float32)
    p["w4"] = 0.1 * jax.random.normal(ks[3], (dim_h * 8, dim_h * 4, 4, 4), jnp.float32)
    # BatchNorm affine params (PyTorch default init: gamma=1, beta=0)
    p["g2"] = jnp.ones((dim_h * 2,), jnp.float32); p["b2"] = jnp.zeros((dim_h * 2,), jnp.float32)
    p["g3"] = jnp.ones((dim_h * 4,), jnp.float32); p["b3"] = jnp.zeros((dim_h * 4,), jnp.float32)
    p["g4"] = jnp.ones((dim_h * 8,), jnp.float32); p["b4"] = jnp.zeros((dim_h * 8,), jnp.float32)
    # fc: Linear(dim_h * 2**3, n_z)
    p["fc_w"] = 0.1 * jax.random.normal(ks[4], (n_z, dim_h * 8), jnp.float32)
    p["fc_b"] = 0.1 * jax.random.normal(ks[5], (n_z,), jnp.float32)
    return p


if __name__ == "__main__":
    # small, forward-consistent config: 16x16 -> 8 -> 4 -> 2 -> 1 spatial
    args = {"n_channel": 1, "dim_h": 8, "n_z": 10}
    B = 4
    key = jax.random.PRNGKey(0)
    k_x, k_p = jax.random.split(key)
    x = jax.random.normal(k_x, (B, args["n_channel"], 16, 16), jnp.float32)
    params = make_params(k_p, args["n_channel"], args["dim_h"], args["n_z"])

    # TODO(synk): BatchNorm running-stat updates (a training-time side effect)
    # are not modeled; they do not affect this forward's output.
    out = jax.jit(encoder_forward)(x, params)
    out = jax.block_until_ready(out)
    assert out.shape == (B, args["n_z"]) and out.dtype == jnp.float32
    print("KERNEL_OK")
</pallas_src>

<mosaic_0001>
module attributes {stable_mosaic.version = 11 : i64} {
  func.func @_conv_lrelu_kernel(%arg0: i32, %arg1: memref<256x16xbf16, #tpu.memory_space<vmem>>, %arg2: memref<16x8xbf16, #tpu.memory_space<vmem>>, %arg3: memref<256x8xbf16, #tpu.memory_space<vmem>>) attributes {dimension_semantics = [#tpu.dimension_semantics<parallel>], iteration_bounds = array<i64: 1>, scalar_prefetch = 0 : i64, scratch_operands = 0 : i64, tpu.core_type = #tpu.core_type<tc>, window_params = [{transform_indices = @transform_0, window_bounds = array<i64: 256, 16>}, {pipeline_mode = #tpu.pipeline_mode<synchronous>, transform_indices = @transform_1, window_bounds = array<i64: 16, 8>}, {transform_indices = @transform_2, window_bounds = array<i64: 256, 8>}]} {
    %c0 = arith.constant 0 : index
    %c0_0 = arith.constant 0 : index
    %0 = vector.load %arg1[%c0, %c0_0] : memref<256x16xbf16, #tpu.memory_space<vmem>>, vector<256x16xbf16>
    %c0_1 = arith.constant 0 : index
    %c0_2 = arith.constant 0 : index
    %1 = vector.load %arg2[%c0_1, %c0_2] : memref<16x8xbf16, #tpu.memory_space<vmem>>, vector<16x8xbf16>
    %cst = arith.constant dense<0.000000e+00> : vector<256x8xf32>
    %2 = tpu.matmul %0, %1, %cst {dimension_numbers = #tpu.dot_dimension_numbers<[1], [0], [0], [1], [0, 0, 1, 1], [], []>} : vector<256x16xbf16>, vector<16x8xbf16>, vector<256x8xf32> -> vector<256x8xf32>
    %cst_3 = arith.constant 0.000000e+00 : f32
    %3 = vector.broadcast %cst_3 : f32 to vector<256x8xf32>
    %4 = arith.cmpf ogt, %2, %3 : vector<256x8xf32>
    %cst_4 = arith.constant 2.000000e-01 : f32
    %5 = vector.broadcast %cst_4 : f32 to vector<256x8xf32>
    %6 = arith.mulf %5, %2 : vector<256x8xf32>
    %7 = arith.select %4, %2, %6 : vector<256x8xi1>, vector<256x8xf32>
    %8 = arith.truncf %7 : vector<256x8xf32> to vector<256x8xbf16>
    %c0_5 = arith.constant 0 : index
    %c0_6 = arith.constant 0 : index
    %9 = vector.load %arg3[%c0_5, %c0_6] : memref<256x8xbf16, #tpu.memory_space<vmem>>, vector<256x8xbf16>
    tpu.vector_store %arg3[%c0_5, %c0_6], %8 {strides = array<i32>} : memref<256x8xbf16, #tpu.memory_space<vmem>>, vector<256x8xbf16>,
    return
  }
  func.func @transform_0(%arg0: i32) -> (i32, i32) {
    %c0_i32 = arith.constant 0 : i32
    %c0_i32_0 = arith.constant 0 : i32
    return %arg0, %c0_i32 : i32, i32
  }
  func.func @transform_1(%arg0: i32) -> (i32, i32) {
    %c0_i32 = arith.constant 0 : i32
    %c0_i32_0 = arith.constant 0 : i32
    %c0_i32_1 = arith.constant 0 : i32
    return %c0_i32, %c0_i32_0 : i32, i32
  }
  func.func @transform_2(%arg0: i32) -> (i32, i32) {
    %c0_i32 = arith.constant 0 : i32
    %c0_i32_0 = arith.constant 0 : i32
    return %arg0, %c0_i32 : i32, i32
  }
}

module attributes {stable_mosaic.version = 11 : i64} {
  func.func @_conv_bn_lrelu_kernel(%arg0: memref<64x128xbf16, #tpu.memory_space<vmem>>, %arg1: memref<128x16xbf16, #tpu.memory_space<vmem>>, %arg2: memref<1x16xf32, #tpu.memory_space<vmem>>, %arg3: memref<1x16xf32, #tpu.memory_space<vmem>>, %arg4: memref<64x16xbf16, #tpu.memory_space<vmem>>) attributes {dimension_semantics = [], scalar_prefetch = 0 : i64, scratch_operands = 0 : i64, tpu.core_type = #tpu.core_type<tc>} {
    %c0 = arith.constant 0 : index
    %c0_0 = arith.constant 0 : index
    %0 = vector.load %arg0[%c0, %c0_0] : memref<64x128xbf16, #tpu.memory_space<vmem>>, vector<64x128xbf16>
    %c0_1 = arith.constant 0 : index
    %c0_2 = arith.constant 0 : index
    %1 = vector.load %arg1[%c0_1, %c0_2] : memref<128x16xbf16, #tpu.memory_space<vmem>>, vector<128x16xbf16>
    %cst = arith.constant dense<0.000000e+00> : vector<64x16xf32>
    %2 = tpu.matmul %0, %1, %cst {dimension_numbers = #tpu.dot_dimension_numbers<[1], [0], [0], [1], [0, 0, 1, 1], [], []>} : vector<64x128xbf16>, vector<128x16xbf16>, vector<64x16xf32> -> vector<64x16xf32>
    %cst_3 = arith.constant dense<0.000000e+00> : vector<16xf32>
    %3 = vector.multi_reduction <add>, %2, %cst_3 [0] : vector<64x16xf32> to vector<16xf32>
    %4 = vector.shape_cast %3 : vector<16xf32> to vector<1x16xf32>
    %5 = arith.mulf %2, %2 : vector<64x16xf32>
    %cst_4 = arith.constant dense<0.000000e+00> : vector<16xf32>
    %6 = vector.multi_reduction <add>, %5, %cst_4 [0] : vector<64x16xf32> to vector<16xf32>
    %7 = vector.shape_cast %6 : vector<16xf32> to vector<1x16xf32>
    %cst_5 = arith.constant 1.562500e-02 : f32
    %8 = vector.broadcast %cst_5 : f32 to vector<1x16xf32>
    %9 = arith.mulf %4, %8 : vector<1x16xf32>
    %cst_6 = arith.constant 1.562500e-02 : f32
    %10 = vector.broadcast %cst_6 : f32 to vector<1x16xf32>
    %11 = arith.mulf %7, %10 : vector<1x16xf32>
    %12 = arith.mulf %9, %9 : vector<1x16xf32>
    %13 = arith.subf %11, %12 : vector<1x16xf32>
    %cst_7 = arith.constant 0.000000e+00 : f32
    %14 = vector.broadcast %cst_7 : f32 to vector<1x16xf32>
    %15 = arith.maximumf %13, %14 : vector<1x16xf32>
    %cst_8 = arith.constant 9.99999974E-6 : f32
    %16 = vector.broadcast %cst_8 : f32 to vector<1x16xf32>
    %17 = arith.addf %15, %16 : vector<1x16xf32>
    %18 = math.rsqrt %17 : vector<1x16xf32>
    %c0_9 = arith.constant 0 : index
    %c0_10 = arith.constant 0 : index
    %19 = vector.load %arg2[%c0_9, %c0_10] : memref<1x16xf32, #tpu.memory_space<vmem>>, vector<1x16xf32>
    %20 = arith.mulf %18, %19 : vector<1x16xf32>
    %c0_11 = arith.constant 0 : index
    %c0_12 = arith.constant 0 : index
    %21 = vector.load %arg3[%c0_11, %c0_12] : memref<1x16xf32, #tpu.memory_space<vmem>>, vector<1x16xf32>
    %22 = arith.mulf %9, %20 : vector<1x16xf32>
    %23 = arith.subf %21, %22 : vector<1x16xf32>
    %24 = vector.broadcast %20 : vector<1x16xf32> to vector<64x16xf32>
    %25 = arith.mulf %2, %24 : vector<64x16xf32>
    %26 = vector.broadcast %23 : vector<1x16xf32> to vector<64x16xf32>
    %27 = arith.addf %25, %26 : vector<64x16xf32>
    %cst_13 = arith.constant 0.000000e+00 : f32
    %28 = vector.broadcast %cst_13 : f32 to vector<64x16xf32>
    %29 = arith.cmpf ogt, %27, %28 : vector<64x16xf32>
    %cst_14 = arith.constant 2.000000e-01 : f32
    %30 = vector.broadcast %cst_14 : f32 to vector<64x16xf32>
    %31 = arith.mulf %30, %27 : vector<64x16xf32>
    %32 = arith.select %29, %27, %31 : vector<64x16xi1>, vector<64x16xf32>
    %33 = arith.truncf %32 : vector<64x16xf32> to vector<64x16xbf16>
    %c0_15 = arith.constant 0 : index
    %c0_16 = arith.constant 0 : index
    %34 = vector.load %arg4[%c0_15, %c0_16] : memref<64x16xbf16, #tpu.memory_space<vmem>>, vector<64x16xbf16>
    tpu.vector_store %arg4[%c0_15, %c0_16], %33 {strides = array<i32>} : memref<64x16xbf16, #tpu.memory_space<vmem>>, vector<64x16xbf16>,
    return
  }
}

module attributes {stable_mosaic.version = 11 : i64} {
  func.func @_conv_bn_lrelu_kernel(%arg0: memref<16x256xbf16, #tpu.memory_space<vmem>>, %arg1: memref<256x32xbf16, #tpu.memory_space<vmem>>, %arg2: memref<1x32xf32, #tpu.memory_space<vmem>>, %arg3: memref<1x32xf32, #tpu.memory_space<vmem>>, %arg4: memref<16x32xbf16, #tpu.memory_space<vmem>>) attributes {dimension_semantics = [], scalar_prefetch = 0 : i64, scratch_operands = 0 : i64, tpu.core_type = #tpu.core_type<tc>} {
    %c0 = arith.constant 0 : index
    %c0_0 = arith.constant 0 : index
    %0 = vector.load %arg0[%c0, %c0_0] : memref<16x256xbf16, #tpu.memory_space<vmem>>, vector<16x256xbf16>
    %c0_1 = arith.constant 0 : index
    %c0_2 = arith.constant 0 : index
    %1 = vector.load %arg1[%c0_1, %c0_2] : memref<256x32xbf16, #tpu.memory_space<vmem>>, vector<256x32xbf16>
    %cst = arith.constant dense<0.000000e+00> : vector<16x32xf32>
    %2 = tpu.matmul %0, %1, %cst {dimension_numbers = #tpu.dot_dimension_numbers<[1], [0], [0], [1], [0, 0, 1, 1], [], []>} : vector<16x256xbf16>, vector<256x32xbf16>, vector<16x32xf32> -> vector<16x32xf32>
    %cst_3 = arith.constant dense<0.000000e+00> : vector<32xf32>
    %3 = vector.multi_reduction <add>, %2, %cst_3 [0] : vector<16x32xf32> to vector<32xf32>
    %4 = vector.shape_cast %3 : vector<32xf32> to vector<1x32xf32>
    %5 = arith.mulf %2, %2 : vector<16x32xf32>
    %cst_4 = arith.constant dense<0.000000e+00> : vector<32xf32>
    %6 = vector.multi_reduction <add>, %5, %cst_4 [0] : vector<16x32xf32> to vector<32xf32>
    %7 = vector.shape_cast %6 : vector<32xf32> to vector<1x32xf32>
    %cst_5 = arith.constant 6.250000e-02 : f32
    %8 = vector.broadcast %cst_5 : f32 to vector<1x32xf32>
    %9 = arith.mulf %4, %8 : vector<1x32xf32>
    %cst_6 = arith.constant 6.250000e-02 : f32
    %10 = vector.broadcast %cst_6 : f32 to vector<1x32xf32>
    %11 = arith.mulf %7, %10 : vector<1x32xf32>
    %12 = arith.mulf %9, %9 : vector<1x32xf32>
    %13 = arith.subf %11, %12 : vector<1x32xf32>
    %cst_7 = arith.constant 0.000000e+00 : f32
    %14 = vector.broadcast %cst_7 : f32 to vector<1x32xf32>
    %15 = arith.maximumf %13, %14 : vector<1x32xf32>
    %cst_8 = arith.constant 9.99999974E-6 : f32
    %16 = vector.broadcast %cst_8 : f32 to vector<1x32xf32>
    %17 = arith.addf %15, %16 : vector<1x32xf32>
    %18 = math.rsqrt %17 : vector<1x32xf32>
    %c0_9 = arith.constant 0 : index
    %c0_10 = arith.constant 0 : index
    %19 = vector.load %arg2[%c0_9, %c0_10] : memref<1x32xf32, #tpu.memory_space<vmem>>, vector<1x32xf32>
    %20 = arith.mulf %18, %19 : vector<1x32xf32>
    %c0_11 = arith.constant 0 : index
    %c0_12 = arith.constant 0 : index
    %21 = vector.load %arg3[%c0_11, %c0_12] : memref<1x32xf32, #tpu.memory_space<vmem>>, vector<1x32xf32>
    %22 = arith.mulf %9, %20 : vector<1x32xf32>
    %23 = arith.subf %21, %22 : vector<1x32xf32>
    %24 = vector.broadcast %20 : vector<1x32xf32> to vector<16x32xf32>
    %25 = arith.mulf %2, %24 : vector<16x32xf32>
    %26 = vector.broadcast %23 : vector<1x32xf32> to vector<16x32xf32>
    %27 = arith.addf %25, %26 : vector<16x32xf32>
    %cst_13 = arith.constant 0.000000e+00 : f32
    %28 = vector.broadcast %cst_13 : f32 to vector<16x32xf32>
    %29 = arith.cmpf ogt, %27, %28 : vector<16x32xf32>
    %cst_14 = arith.constant 2.000000e-01 : f32
    %30 = vector.broadcast %cst_14 : f32 to vector<16x32xf32>
    %31 = arith.mulf %30, %27 : vector<16x32xf32>
    %32 = arith.select %29, %27, %31 : vector<16x32xi1>, vector<16x32xf32>
    %33 = arith.truncf %32 : vector<16x32xf32> to vector<16x32xbf16>
    %c0_15 = arith.constant 0 : index
    %c0_16 = arith.constant 0 : index
    %34 = vector.load %arg4[%c0_15, %c0_16] : memref<16x32xbf16, #tpu.memory_space<vmem>>, vector<16x32xbf16>
    tpu.vector_store %arg4[%c0_15, %c0_16], %33 {strides = array<i32>} : memref<16x32xbf16, #tpu.memory_space<vmem>>, vector<16x32xbf16>,
    return
  }
}

module attributes {stable_mosaic.version = 11 : i64} {
  func.func @_conv_bn_lrelu_fc_kernel(%arg0: memref<4x512xbf16, #tpu.memory_space<vmem>>, %arg1: memref<512x64xbf16, #tpu.memory_space<vmem>>, %arg2: memref<1x64xf32, #tpu.memory_space<vmem>>, %arg3: memref<1x64xf32, #tpu.memory_space<vmem>>, %arg4: memref<64x10xbf16, #tpu.memory_space<vmem>>, %arg5: memref<1x10xf32, #tpu.memory_space<vmem>>, %arg6: memref<4x10xf32, #tpu.memory_space<vmem>>) attributes {dimension_semantics = [], scalar_prefetch = 0 : i64, scratch_operands = 0 : i64, tpu.core_type = #tpu.core_type<tc>} {
    %c0 = arith.constant 0 : index
    %c0_0 = arith.constant 0 : index
    %0 = vector.load %arg0[%c0, %c0_0] : memref<4x512xbf16, #tpu.memory_space<vmem>>, vector<4x512xbf16>
    %c0_1 = arith.constant 0 : index
    %c0_2 = arith.constant 0 : index
    %1 = vector.load %arg1[%c0_1, %c0_2] : memref<512x64xbf16, #tpu.memory_space<vmem>>, vector<512x64xbf16>
    %cst = arith.constant dense<0.000000e+00> : vector<4x64xf32>
    %2 = tpu.matmul %0, %1, %cst {dimension_numbers = #tpu.dot_dimension_numbers<[1], [0], [0], [1], [0, 0, 1, 1], [], []>} : vector<4x512xbf16>, vector<512x64xbf16>, vector<4x64xf32> -> vector<4x64xf32>
    %cst_3 = arith.constant dense<0.000000e+00> : vector<64xf32>
    %3 = vector.multi_reduction <add>, %2, %cst_3 [0] : vector<4x64xf32> to vector<64xf32>
    %4 = vector.shape_cast %3 : vector<64xf32> to vector<1x64xf32>
    %5 = arith.mulf %2, %2 : vector<4x64xf32>
    %cst_4 = arith.constant dense<0.000000e+00> : vector<64xf32>
    %6 = vector.multi_reduction <add>, %5, %cst_4 [0] : vector<4x64xf32> to vector<64xf32>
    %7 = vector.shape_cast %6 : vector<64xf32> to vector<1x64xf32>
    %cst_5 = arith.constant 2.500000e-01 : f32
    %8 = vector.broadcast %cst_5 : f32 to vector<1x64xf32>
    %9 = arith.mulf %4, %8 : vector<1x64xf32>
    %cst_6 = arith.constant 2.500000e-01 : f32
    %10 = vector.broadcast %cst_6 : f32 to vector<1x64xf32>
    %11 = arith.mulf %7, %10 : vector<1x64xf32>
    %12 = arith.mulf %9, %9 : vector<1x64xf32>
    %13 = arith.subf %11, %12 : vector<1x64xf32>
    %cst_7 = arith.constant 0.000000e+00 : f32
    %14 = vector.broadcast %cst_7 : f32 to vector<1x64xf32>
    %15 = arith.maximumf %13, %14 : vector<1x64xf32>
    %cst_8 = arith.constant 9.99999974E-6 : f32
    %16 = vector.broadcast %cst_8 : f32 to vector<1x64xf32>
    %17 = arith.addf %15, %16 : vector<1x64xf32>
    %18 = math.rsqrt %17 : vector<1x64xf32>
    %c0_9 = arith.constant 0 : index
    %c0_10 = arith.constant 0 : index
    %19 = vector.load %arg2[%c0_9, %c0_10] : memref<1x64xf32, #tpu.memory_space<vmem>>, vector<1x64xf32>
    %20 = arith.mulf %18, %19 : vector<1x64xf32>
    %c0_11 = arith.constant 0 : index
    %c0_12 = arith.constant 0 : index
    %21 = vector.load %arg3[%c0_11, %c0_12] : memref<1x64xf32, #tpu.memory_space<vmem>>, vector<1x64xf32>
    %22 = arith.mulf %9, %20 : vector<1x64xf32>
    %23 = arith.subf %21, %22 : vector<1x64xf32>
    %24 = vector.broadcast %20 : vector<1x64xf32> to vector<4x64xf32>
    %25 = arith.mulf %2, %24 : vector<4x64xf32>
    %26 = vector.broadcast %23 : vector<1x64xf32> to vector<4x64xf32>
    %27 = arith.addf %25, %26 : vector<4x64xf32>
    %cst_13 = arith.constant 0.000000e+00 : f32
    %28 = vector.broadcast %cst_13 : f32 to vector<4x64xf32>
    %29 = arith.cmpf ogt, %27, %28 : vector<4x64xf32>
    %cst_14 = arith.constant 2.000000e-01 : f32
    %30 = vector.broadcast %cst_14 : f32 to vector<4x64xf32>
    %31 = arith.mulf %30, %27 : vector<4x64xf32>
    %32 = arith.select %29, %27, %31 : vector<4x64xi1>, vector<4x64xf32>
    %33 = arith.truncf %32 : vector<4x64xf32> to vector<4x64xbf16>
    %c0_15 = arith.constant 0 : index
    %c0_16 = arith.constant 0 : index
    %34 = vector.load %arg4[%c0_15, %c0_16] : memref<64x10xbf16, #tpu.memory_space<vmem>>, vector<64x10xbf16>
    %cst_17 = arith.constant dense<0.000000e+00> : vector<4x10xf32>
    %35 = tpu.matmul %33, %34, %cst_17 {dimension_numbers = #tpu.dot_dimension_numbers<[1], [0], [0], [1], [0, 0, 1, 1], [], []>} : vector<4x64xbf16>, vector<64x10xbf16>, vector<4x10xf32> -> vector<4x10xf32>
    %c0_18 = arith.constant 0 : index
    %c0_19 = arith.constant 0 : index
    %36 = vector.load %arg5[%c0_18, %c0_19] : memref<1x10xf32, #tpu.memory_space<vmem>>, vector<1x10xf32>
    %37 = vector.broadcast %36 : vector<1x10xf32> to vector<4x10xf32>
    %38 = arith.addf %35, %37 : vector<4x10xf32>
    %c0_20 = arith.constant 0 : index
    %c0_21 = arith.constant 0 : index
    %39 = vector.load %arg6[%c0_20, %c0_21] : memref<4x10xf32, #tpu.memory_space<vmem>>, vector<4x10xf32>
    tpu.vector_store %arg6[%c0_20, %c0_21], %38 {strides = array<i32>} : memref<4x10xf32, #tpu.memory_space<vmem>>, vector<4x10xf32>,
    return
  }
}

</mosaic_0001>

<bundles_post_ra>
// kernel: encoder_forward.4
= control target key start
LH: loop header
LB: loop body
LE: loop exit
PB: predicated region body
PF: predicated region fallthrough
CT: control target
= control target key end

     0   :  { %vm132_vm0 = vcmask 130048   ;;  %vm566_vm3 = vcmask 60416   ;;  %s980_s1 = inlined_call_operand.vmem [shape: bf16[16,8], index: 1, kind: input, shape index: {}]   ;;  %s981_s0 = inlined_call_operand.vmem [shape: bf16[256,16], index: 0, kind: input, shape index: {}]   ;;  %s982_s2 = inlined_call_operand.vmem [shape: bf16[256,8], index: 2, kind: output, shape index: {}]  }
   0x1   :  { %v753_v0 = vld [vmem:[%s980_s1] sm:$0xff]   ;;  %v756_v3 = vld [vmem:[%s981_s0 + $0x8] sm:$0xff]   ;;  %v758_v5 = vld [vmem:[%s981_s0 + $0x10] sm:$0xff]  }
   0x2   :  { %v754_v1 = vld [vmem:[%s981_s0] sm:$0xff]   ;;  %717 = vmatprep.subr.bf16.mxu0 %v753_v0  ;;  %751 = vmatprep.subr.bf16.mxu1 %v753_v0  ;;  %v757_v4 = vld [vmem:[%s981_s0 + $0x48] sm:$0xff]   ;;  %v759_v6 = vld [vmem:[%s981_s0 + $0x50] sm:$0xff]  }
   0x3   :  { %v755_v2 = vld [vmem:[%s981_s0 + $0x40] sm:$0xff]   ;;  %718 = vmatpush3.bf16.msra.mxu0 %v753_v0  ;;  %752 = vmatpush3.bf16.msra.mxu1 %v753_v0  ;;  %v760_v7 = vld [vmem:[%s981_s0 + $0x18] sm:$0xff]   ;;  %v764_v11 = vld [vmem:[%s981_s0 + $0x28] sm:$0xff]  }
   0x4   :  { %719 = vmatprep.mubr.msk.bf16.mxu0 %vm132_vm0, %v754_v1  ;;  %735 = vmatprep.mubr.msk.bf16.mxu1 %vm132_vm0, %v755_v2  ;;  %v761_v8 = vld [vmem:[%s981_s0 + $0x58] sm:$0xff]   ;;  %v762_v9 = vld [vmem:[%s981_s0 + $0x20] sm:$0xff]   ;;  %v765_v12 = vld [vmem:[%s981_s0 + $0x68] sm:$0xff]  }
   0x5   :  { %v763_v10 = vld [vmem:[%s981_s0 + $0x60] sm:$0xff]   ;;  %v766_v13 = vld [vmem:[%s981_s0 + $0x30] sm:$0xff]   ;;  %v768_v15 = vld [vmem:[%s981_s0 + $0x38] sm:$0xff]  }
   0x6   :  { %720 = vmatmul.mubr.msk.bf16.vlgmr.msra.gmra.mxu0 %vm132_vm0, %v756_v3  ;;  %736 = vmatmul.mubr.msk.bf16.vlgmr.msra.gmra.mxu1 %vm132_vm0, %v757_v4  ;;  %v767_v14 = vld [vmem:[%s981_s0 + $0x70] sm:$0xff]   ;;  %v769_v16 = vld [vmem:[%s981_s0 + $0x78] sm:$0xff]  }
   0x7   :  { %723 = vmatprep.mubr.msk.bf16.mxu0 %vm132_vm0, %v758_v5  ;;  %739 = vmatprep.mubr.msk.bf16.mxu1 %vm132_vm0, %v759_v6 }
   0xe   :  { %724 = vmatmul.mubr.msk.bf16.gmra.mxu0 %vm132_vm0, %v760_v7  ;;  %740 = vmatmul.mubr.msk.bf16.gmra.mxu1 %vm132_vm0, %v761_v8 }
   0xf   :  { %727 = vmatprep.mubr.msk.bf16.mxu0 %vm132_vm0, %v762_v9  ;;  %743 = vmatprep.mubr.msk.bf16.mxu1 %vm132_vm0, %v763_v10 }
  0x16   :  { %728 = vmatmul.mubr.msk.bf16.gmra.mxu0 %vm132_vm0, %v764_v11  ;;  %744 = vmatmul.mubr.msk.bf16.gmra.mxu1 %vm132_vm0, %v765_v12 }
  0x17   :  { %731 = vmatprep.mubr.msk.bf16.mxu0 %vm132_vm0, %v766_v13  ;;  %747 = vmatprep.mubr.msk.bf16.mxu1 %vm132_vm0, %v767_v14 }
  0x1e   :  { %732 = vmatmul.mubr.msk.bf16.gmra.mxu0 %vm132_vm0, %v768_v15  ;;  %748 = vmatmul.mubr.msk.bf16.gmra.mxu1 %vm132_vm0, %v769_v16 }
  0xc6   :  { %v721_v17 = vpop.f32.mrf.mxu0  ;;  %v737_v18 = vpop.f32.mrf.mxu1 }
  0xc7   :  { %vm344_vm1 = vcmp.gt.f32.partialorder %v721_v17, 0.0  ;;  %v376_v19 = vmul.f32 0.2, %v721_v17  ;;  %vm360_vm2 = vcmp.gt.f32.partialorder %v737_v18, 0.0  ;;  %v392_v20 = vmul.f32 0.2, %v737_v18 }
  0xc8   :  { %v215_v21 = vpop.f32.mrf.mxu0  ;;  %v279_v22 = vpop.f32.mrf.mxu1 }
  0xc9   :  { %v408_v23 = vsel %vm344_vm1, %v721_v17, %v376_v19  ;;  %v424_v24 = vsel %vm360_vm2, %v737_v18, %v392_v20  ;;  %vm342_vm4 = vcmp.gt.f32.partialorder %v215_v21, 0.0  ;;  %v374_v25 = vmul.f32 0.2, %v215_v21 }
  0xca   :  { %v670_v26 = vpack.c.bf16 %v408_v23, %v408_v23  ;;  %v686_v27 = vpack.c.bf16 %v424_v24, %v424_v24  ;;  %vm358_vm5 = vcmp.gt.f32.partialorder %v279_v22, 0.0  ;;  %v390_v28 = vmul.f32 0.2, %v279_v22  ;;  %v722_v29 = vpop.f32.mrf.mxu0  ;;  %v738_v30 = vpop.f32.mrf.mxu1 }
  0xcb   :  { %v406_v31 = vsel %vm342_vm4, %v215_v21, %v374_v25  ;;  %vm345_vm6 = vcmp.gt.f32.partialorder %v722_v29, 0.0  ;;  %v377_v32 = vmul.f32 0.2, %v722_v29  ;;  %vm361_vm7 = vcmp.gt.f32.partialorder %v738_v30, 0.0 }
  0xcc   :  { %569 = vst.msk [vmem:[%s982_s2 + $0x8] sm:$0xf] %vm566_vm3, %v670_v26  ;;  %585 = vst.msk [vmem:[%s982_s2 + $0x48] sm:$0xf] %vm566_vm3, %v686_v27  ;;  %v668_v33 = vpack.c.bf16 %v406_v31, %v406_v31  ;;  %v422_v34 = vsel %vm358_vm5, %v279_v22, %v390_v28  ;;  %v393_v35 = vmul.f32 0.2, %v738_v30  ;;  %v218_v36 = vpop.f32.mrf.mxu0  ;;  %v282_v37 = vpop.f32.mrf.mxu1 }
  0xcd   :  { %v684_v38 = vpack.c.bf16 %v422_v34, %v422_v34  ;;  %v409_v39 = vsel %vm345_vm6, %v722_v29, %v377_v32  ;;  %vm343_vm8 = vcmp.gt.f32.partialorder %v218_v36, 0.0  ;;  %v375_v40 = vmul.f32 0.2, %v218_v36 }
  0xce   :  { %567 = vst.msk [vmem:[%s982_s2] sm:$0xf] %vm566_vm3, %v668_v33  ;;  %v671_v41 = vpack.c.bf16 %v409_v39, %v409_v39  ;;  %v425_v42 = vsel %vm361_vm7, %v738_v30, %v393_v35  ;;  %vm359_vm9 = vcmp.gt.f32.partialorder %v282_v37, 0.0  ;;  %v391_v43 = vmul.f32 0.2, %v282_v37  ;;  %v725_v44 = vpop.f32.mrf.mxu0  ;;  %v741_v45 = vpop.f32.mrf.mxu1 }
  0xcf   :  { %583 = vst.msk [vmem:[%s982_s2 + $0x40] sm:$0xf] %vm566_vm3, %v684_v38  ;;  %v687_v46 = vpack.c.bf16 %v425_v42, %v425_v42  ;;  %v407_v47 = vsel %vm343_vm8, %v218_v36, %v375_v40  ;;  %vm348_vm10 = vcmp.gt.f32.partialorder %v725_v44, 0.0  ;;  %v380_v48 = vmul.f32 0.2, %v725_v44 }
  0xd0   :  { %570 = vst.msk [vmem:[%s982_s2 + $0xc] sm:$0xf] %vm566_vm3, %v671_v41  ;;  %v669_v49 = vpack.c.bf16 %v407_v47, %v407_v47  ;;  %v423_v50 = vsel %vm359_vm9, %v282_v37, %v391_v43  ;;  %vm364_vm11 = vcmp.gt.f32.partialorder %v741_v45, 0.0  ;;  %v396_v51 = vmul.f32 0.2, %v741_v45  ;;  %v231_v52 = vpop.f32.mrf.mxu0  ;;  %v295_v53 = vpop.f32.mrf.mxu1 }
  0xd1   :  { %586 = vst.msk [vmem:[%s982_s2 + $0x4c] sm:$0xf] %vm566_vm3, %v687_v46  ;;  %v685_v54 = vpack.c.bf16 %v423_v50, %v423_v50  ;;  %v412_v55 = vsel %vm348_vm10, %v725_v44, %v380_v48  ;;  %vm346_vm12 = vcmp.gt.f32.partialorder %v231_v52, 0.0  ;;  %v378_v56 = vmul.f32 0.2, %v231_v52 }
  0xd2   :  { %568 = vst.msk [vmem:[%s982_s2 + $0x4] sm:$0xf] %vm566_vm3, %v669_v49  ;;  %v674_v57 = vpack.c.bf16 %v412_v55, %v412_v55  ;;  %v428_v58 = vsel %vm364_vm11, %v741_v45, %v396_v51  ;;  %vm362_vm13 = vcmp.gt.f32.partialorder %v295_v53, 0.0  ;;  %v394_v59 = vmul.f32 0.2, %v295_v53  ;;  %v726_v60 = vpop.f32.mrf.mxu0  ;;  %v742_v61 = vpop.f32.mrf.mxu1 }
  0xd3   :  { %584 = vst.msk [vmem:[%s982_s2 + $0x44] sm:$0xf] %vm566_vm3, %v685_v54  ;;  %v690_v62 = vpack.c.bf16 %v428_v58, %v428_v58  ;;  %v410_v63 = vsel %vm346_vm12, %v231_v52, %v378_v56  ;;  %vm349_vm14 = vcmp.gt.f32.partialorder %v726_v60, 0.0  ;;  %v381_v0 = vmul.f32 0.2, %v726_v60 }
  0xd4   :  { %573 = vst.msk [vmem:[%s982_s2 + $0x18] sm:$0xf] %vm566_vm3, %v674_v57  ;;  %v672_v1 = vpack.c.bf16 %v410_v63, %v410_v63  ;;  %v426_v2 = vsel %vm362_vm13, %v295_v53, %v394_v59  ;;  %vm365_vm15 = vcmp.gt.f32.partialorder %v742_v61, 0.0  ;;  %v397_v3 = vmul.f32 0.2, %v742_v61  ;;  %v234_v4 = vpop.f32.mrf.mxu0  ;;  %v298_v5 = vpop.f32.mrf.mxu1 }
  0xd5   :  { %589 = vst.msk [vmem:[%s982_s2 + $0x58] sm:$0xf] %vm566_vm3, %v690_v62  ;;  %v688_v6 = vpack.c.bf16 %v426_v2, %v426_v2  ;;  %v413_v7 = vsel %vm349_vm14, %v726_v60, %v381_v0  ;;  %vm347_vm0 = vcmp.gt.f32.partialorder %v234_v4, 0.0  ;;  %v379_v8 = vmul.f32 0.2, %v234_v4 }
  0xd6   :  { %571 = vst.msk [vmem:[%s982_s2 + $0x10] sm:$0xf] %vm566_vm3, %v672_v1  ;;  %v675_v9 = vpack.c.bf16 %v413_v7, %v413_v7  ;;  %v429_v10 = vsel %vm365_vm15, %v742_v61, %v397_v3  ;;  %vm363_vm1 = vcmp.gt.f32.partialorder %v298_v5, 0.0  ;;  %v395_v11 = vmul.f32 0.2, %v298_v5  ;;  %v729_v12 = vpop.f32.mrf.mxu0  ;;  %v745_v13 = vpop.f32.mrf.mxu1 }
  0xd7   :  { %587 = vst.msk [vmem:[%s982_s2 + $0x50] sm:$0xf] %vm566_vm3, %v688_v6  ;;  %v691_v14 = vpack.c.bf16 %v429_v10, %v429_v10  ;;  %v411_v15 = vsel %vm347_vm0, %v234_v4, %v379_v8  ;;  %vm352_vm2 = vcmp.gt.f32.partialorder %v729_v12, 0.0  ;;  %v384_v16 = vmul.f32 0.2, %v729_v12 }
  0xd8   :  { %574 = vst.msk [vmem:[%s982_s2 + $0x1c] sm:$0xf] %vm566_vm3, %v675_v9  ;;  %v673_v17 = vpack.c.bf16 %v411_v15, %v411_v15  ;;  %v427_v18 = vsel %vm363_vm1, %v298_v5, %v395_v11  ;;  %vm368_vm4 = vcmp.gt.f32.partialorder %v745_v13, 0.0  ;;  %v400_v19 = vmul.f32 0.2, %v745_v13  ;;  %v247_v20 = vpop.f32.mrf.mxu0  ;;  %v311_v21 = vpop.f32.mrf.mxu1 }
  0xd9   :  { %590 = vst.msk [vmem:[%s982_s2 + $0x5c] sm:$0xf] %vm566_vm3, %v691_v14  ;;  %v689_v22 = vpack.c.bf16 %v427_v18, %v427_v18  ;;  %v416_v23 = vsel %vm352_vm2, %v729_v12, %v384_v16  ;;  %vm350_vm5 = vcmp.gt.f32.partialorder %v247_v20, 0.0  ;;  %v382_v24 = vmul.f32 0.2, %v247_v20 }
  0xda   :  { %572 = vst.msk [vmem:[%s982_s2 + $0x14] sm:$0xf] %vm566_vm3, %v673_v17  ;;  %v678_v25 = vpack.c.bf16 %v416_v23, %v416_v23  ;;  %v432_v26 = vsel %vm368_vm4, %v745_v13, %v400_v19  ;;  %vm366_vm6 = vcmp.gt.f32.partialorder %v311_v21, 0.0  ;;  %v398_v27 = vmul.f32 0.2, %v311_v21  ;;  %v730_v28 = vpop.f32.mrf.mxu0  ;;  %v746_v29 = vpop.f32.mrf.mxu1 }
  0xdb   :  { %588 = vst.msk [vmem:[%s982_s2 + $0x54] sm:$0xf] %vm566_vm3, %v689_v22  ;;  %v694_v30 = vpack.c.bf16 %v432_v26, %v432_v26  ;;  %v414_v31 = vsel %vm350_vm5, %v247_v20, %v382_v24  ;;  %vm353_vm7 = vcmp.gt.f32.partialorder %v730_v28, 0.0  ;;  %v385_v32 = vmul.f32 0.2, %v730_v28 }
  0xdc   :  { %577 = vst.msk [vmem:[%s982_s2 + $0x28] sm:$0xf] %vm566_vm3, %v678_v25  ;;  %v676_v33 = vpack.c.bf16 %v414_v31, %v414_v31  ;;  %v430_v34 = vsel %vm366_vm6, %v311_v21, %v398_v27  ;;  %vm369_vm8 = vcmp.gt.f32.partialorder %v746_v29, 0.0  ;;  %v401_v35 = vmul.f32 0.2, %v746_v29  ;;  %v250_v36 = vpop.f32.mrf.mxu0  ;;  %v314_v37 = vpop.f32.mrf.mxu1 }
  0xdd   :  { %593 = vst.msk [vmem:[%s982_s2 + $0x68] sm:$0xf] %vm566_vm3, %v694_v30  ;;  %v692_v38 = vpack.c.bf16 %v430_v34, %v430_v34  ;;  %v417_v39 = vsel %vm353_vm7, %v730_v28, %v385_v32  ;;  %vm351_vm9 = vcmp.gt.f32.partialorder %v250_v36, 0.0  ;;  %v383_v40 = vmul.f32 0.2, %v250_v36 }
  0xde   :  { %575 = vst.msk [vmem:[%s982_s2 + $0x20] sm:$0xf] %vm566_vm3, %v676_v33  ;;  %v679_v41 = vpack.c.bf16 %v417_v39, %v417_v39  ;;  %v433_v42 = vsel %vm369_vm8, %v746_v29, %v401_v35  ;;  %vm367_vm10 = vcmp.gt.f32.partialorder %v314_v37, 0.0  ;;  %v399_v43 = vmul.f32 0.2, %v314_v37  ;;  %v733_v44 = vpop.f32.mrf.mxu0  ;;  %v749_v45 = vpop.f32.mrf.mxu1 }
  0xdf   :  { %591 = vst.msk [vmem:[%s982_s2 + $0x60] sm:$0xf] %vm566_vm3, %v692_v38  ;;  %v695_v46 = vpack.c.bf16 %v433_v42, %v433_v42  ;;  %v415_v47 = vsel %vm351_vm9, %v250_v36, %v383_v40  ;;  %vm356_vm11 = vcmp.gt.f32.partialorder %v733_v44, 0.0  ;;  %v388_v48 = vmul.f32 0.2, %v733_v44 }
  0xe0   :  { %578 = vst.msk [vmem:[%s982_s2 + $0x2c] sm:$0xf] %vm566_vm3, %v679_v41  ;;  %v677_v49 = vpack.c.bf16 %v415_v47, %v415_v47  ;;  %v431_v50 = vsel %vm367_vm10, %v314_v37, %v399_v43  ;;  %vm372_vm12 = vcmp.gt.f32.partialorder %v749_v45, 0.0  ;;  %v404_v51 = vmul.f32 0.2, %v749_v45  ;;  %v263_v52 = vpop.f32.mrf.mxu0  ;;  %v327_v53 = vpop.f32.mrf.mxu1 }
  0xe1   :  { %594 = vst.msk [vmem:[%s982_s2 + $0x6c] sm:$0xf] %vm566_vm3, %v695_v46  ;;  %v693_v54 = vpack.c.bf16 %v431_v50, %v431_v50  ;;  %v420_v55 = vsel %vm356_vm11, %v733_v44, %v388_v48  ;;  %vm354_vm13 = vcmp.gt.f32.partialorder %v263_v52, 0.0  ;;  %v386_v56 = vmul.f32 0.2, %v263_v52 }
  0xe2   :  { %576 = vst.msk [vmem:[%s982_s2 + $0x24] sm:$0xf] %vm566_vm3, %v677_v49  ;;  %v682_v57 = vpack.c.bf16 %v420_v55, %v420_v55  ;;  %v436_v58 = vsel %vm372_vm12, %v749_v45, %v404_v51  ;;  %vm370_vm14 = vcmp.gt.f32.partialorder %v327_v53, 0.0  ;;  %v402_v59 = vmul.f32 0.2, %v327_v53  ;;  %v734_v60 = vpop.f32.mrf.mxu0  ;;  %v750_v61 = vpop.f32.mrf.mxu1 }
  0xe3   :  { %592 = vst.msk [vmem:[%s982_s2 + $0x64] sm:$0xf] %vm566_vm3, %v693_v54  ;;  %v698_v62 = vpack.c.bf16 %v436_v58, %v436_v58  ;;  %v418_v63 = vsel %vm354_vm13, %v263_v52, %v386_v56  ;;  %vm357_vm15 = vcmp.gt.f32.partialorder %v734_v60, 0.0  ;;  %v389_v0 = vmul.f32 0.2, %v734_v60 }
  0xe4   :  { %581 = vst.msk [vmem:[%s982_s2 + $0x38] sm:$0xf] %vm566_vm3, %v682_v57  ;;  %v680_v1 = vpack.c.bf16 %v418_v63, %v418_v63  ;;  %v434_v2 = vsel %vm370_vm14, %v327_v53, %v402_v59  ;;  %vm373_vm0 = vcmp.gt.f32.partialorder %v750_v61, 0.0  ;;  %v405_v3 = vmul.f32 0.2, %v750_v61  ;;  %v266_v4 = vpop.f32.mrf.mxu0  ;;  %v330_v5 = vpop.f32.mrf.mxu1 }
  0xe5   :  { %597 = vst.msk [vmem:[%s982_s2 + $0x78] sm:$0xf] %vm566_vm3, %v698_v62  ;;  %v696_v6 = vpack.c.bf16 %v434_v2, %v434_v2  ;;  %v421_v7 = vsel %vm357_vm15, %v734_v60, %v389_v0  ;;  %vm355_vm1 = vcmp.gt.f32.partialorder %v266_v4, 0.0  ;;  %v387_v8 = vmul.f32 0.2, %v266_v4 }
  0xe6   :  { %579 = vst.msk [vmem:[%s982_s2 + $0x30] sm:$0xf] %vm566_vm3, %v680_v1  ;;  %v683_v9 = vpack.c.bf16 %v421_v7, %v421_v7  ;;  %v437_v10 = vsel %vm373_vm0, %v750_v61, %v405_v3  ;;  %vm371_vm2 = vcmp.gt.f32.partialorder %v330_v5, 0.0  ;;  %v403_v11 = vmul.f32 0.2, %v330_v5 }
  0xe7   :  { %595 = vst.msk [vmem:[%s982_s2 + $0x70] sm:$0xf] %vm566_vm3, %v696_v6  ;;  %v699_v12 = vpack.c.bf16 %v437_v10, %v437_v10  ;;  %v419_v13 = vsel %vm355_vm1, %v266_v4, %v387_v8 }
  0xe8   :  { %582 = vst.msk [vmem:[%s982_s2 + $0x3c] sm:$0xf] %vm566_vm3, %v683_v9  ;;  %v681_v14 = vpack.c.bf16 %v419_v13, %v419_v13  ;;  %v435_v15 = vsel %vm371_vm2, %v330_v5, %v403_v11 }
  0xe9   :  { %598 = vst.msk [vmem:[%s982_s2 + $0x7c] sm:$0xf] %vm566_vm3, %v699_v12  ;;  %v697_v16 = vpack.c.bf16 %v435_v15, %v435_v15 }
  0xea   :  { %580 = vst.msk [vmem:[%s982_s2 + $0x34] sm:$0xf] %vm566_vm3, %v681_v14 }
  0xeb   :  { %596 = vst.msk [vmem:[%s982_s2 + $0x74] sm:$0xf] %vm566_vm3, %v697_v16 }

// kernel: encoder_forward.5
= control target key start
LH: loop header
LB: loop body
LE: loop exit
PB: predicated region body
PF: predicated region fallthrough
CT: control target
= control target key end

     0   :  { %vm179_vm0 = vcmask 130048   ;;  %vm324_vm1 = vcmask 125952   ;;  %s602_s1 = inlined_call_operand.vmem [shape: bf16[128,16], index: 1, kind: input, shape index: {}]   ;;  %s603_s0 = inlined_call_operand.vmem [shape: bf16[64,128], index: 0, kind: input, shape index: {}]   ;;  %s604_s2 = inlined_call_operand.vmem [shape: f32[1,16], index: 2, kind: input, shape index: {}]   ;;  %s605_s3 = inlined_call_operand.vmem [shape: f32[1,16], index: 3, kind: input, shape index: {}]   ;;  %s606_s4 = inlined_call_operand.vmem [shape: bf16[64,16], index: 4, kind: output, shape index: {}]  }
   0x1   :  { %v417_v0 = vld [vmem:[%s602_s1 + $0x38] sm:$0xff]   ;;  %v418_v1 = vld [vmem:[%s602_s1 + $0x30] sm:$0xff]   ;;  %v419_v2 = vld [vmem:[%s602_s1 + $0x28] sm:$0xff]  }
   0x2   :  { %377 = vmatprep.subr.bf16.mxu0 %v417_v0  ;;  %401 = vmatprep.subr.bf16.mxu1 %v417_v0  ;;  %v420_v3 = vld [vmem:[%s602_s1 + $0x20] sm:$0xff]   ;;  %v427_v5 = vld [vmem:[%s603_s0 + $0x10] sm:$0xff]   ;;  %v421_v6 = vld [vmem:[%s602_s1 + $0x18] sm:$0xff]  }
   0x3   :  { %378 = vmatpush3.bf16.msra.mxu0 %v417_v0  ;;  %409 = vmatpush3.bf16.msra.mxu1 %v417_v0  ;;  %v425_v4 = vld [vmem:[%s603_s0] sm:$0xff]   ;;  %v422_v7 = vld [vmem:[%s602_s1 + $0x10] sm:$0xff]   ;;  %v423_v8 = vld [vmem:[%s602_s1 + $0x8] sm:$0xff]  }
   0x4   :  { %379 = vmatprep.subr.bf16.mxu0 %v418_v1  ;;  %402 = vmatprep.subr.bf16.mxu1 %v418_v1  ;;  %v424_v9 = vld [vmem:[%s602_s1] sm:$0xff]   ;;  %v426_v10 = vld [vmem:[%s603_s0 + $0x8] sm:$0xff]   ;;  %v428_v11 = vld [vmem:[%s603_s0 + $0x18] sm:$0xff]  }
   0x5   :  { %393 = vmatprep.mubr.bf16.mxu0 %v425_v4  ;;  %397 = vmatprep.mubr.bf16.mxu1 %v427_v5 }
   0x7   :  { %380 = vmatpush3.bf16.msra.mxu0 %v418_v1  ;;  %410 = vmatpush3.bf16.msra.mxu1 %v418_v1 }
   0x8   :  { %381 = vmatprep.subr.bf16.mxu0 %v419_v2  ;;  %403 = vmatprep.subr.bf16.mxu1 %v419_v2 }
   0xb   :  { %382 = vmatpush3.bf16.msra.mxu0 %v419_v2  ;;  %411 = vmatpush3.bf16.msra.mxu1 %v419_v2 }
   0xc   :  { %383 = vmatprep.subr.bf16.mxu0 %v420_v3  ;;  %404 = vmatprep.subr.bf16.mxu1 %v420_v3 }
   0xf   :  { %384 = vmatpush3.bf16.msra.mxu0 %v420_v3  ;;  %412 = vmatpush3.bf16.msra.mxu1 %v420_v3 }
  0x10   :  { %385 = vmatprep.subr.bf16.mxu0 %v421_v6  ;;  %405 = vmatprep.subr.bf16.mxu1 %v421_v6 }
  0x13   :  { %386 = vmatpush3.bf16.msra.mxu0 %v421_v6  ;;  %413 = vmatpush3.bf16.msra.mxu1 %v421_v6 }
  0x14   :  { %387 = vmatprep.subr.bf16.mxu0 %v422_v7  ;;  %406 = vmatprep.subr.bf16.mxu1 %v422_v7 }
  0x17   :  { %388 = vmatpush3.bf16.msra.mxu0 %v422_v7  ;;  %414 = vmatpush3.bf16.msra.mxu1 %v422_v7 }
  0x18   :  { %389 = vmatprep.subr.bf16.mxu0 %v423_v8  ;;  %407 = vmatprep.subr.bf16.mxu1 %v423_v8 }
  0x1b   :  { %390 = vmatpush3.bf16.msra.mxu0 %v423_v8  ;;  %415 = vmatpush3.bf16.msra.mxu1 %v423_v8 }
  0x1c   :  { %391 = vmatprep.subr.bf16.mxu0 %v424_v9  ;;  %408 = vmatprep.subr.bf16.mxu1 %v424_v9 }
  0x1f   :  { %392 = vmatpush3.bf16.msra.mxu0 %v424_v9  ;;  %416 = vmatpush3.bf16.msra.mxu1 %v424_v9 }
  0x22   :  { %394 = vmatmul.mubr.bf16.vlgmr.msra.gmra.mxu0 %v426_v10  ;;  %398 = vmatmul.mubr.bf16.vlgmr.msra.gmra.mxu1 %v428_v11 }
  0xe2   :  { %v492_v12 = vpop.f32.mrf.mxu0  ;;  %v494_v13 = vpop.f32.mrf.mxu1 }
  0xe3   :  { %v203_v20 = vmul.f32 %v492_v12, %v492_v12  ;;  %v183_v25 = vsel %vm179_vm0, %v492_v12, 0.0  ;;  %v207_v42 = vmul.f32 %v494_v13, %v494_v13  ;;  %v191_v47 = vsel %vm179_vm0, %v494_v13, 0.0 }
  0xe4   :  { %v496_v14 = vpop.f32.mrf.mxu0  ;;  %v498_v15 = vpop.f32.mrf.mxu1 }
  0xe5   :  { %v201_v17 = vmul.f32 %v496_v14, %v496_v14  ;;  %v180_v21 = vsel %vm179_vm0, %v496_v14, 0.0  ;;  %v212_v32 = vsel %vm179_vm0, %v203_v20, 0.0  ;;  %v205_v34 = vmul.f32 %v498_v15, %v498_v15 }
  0xe6   :  { %v500_v16 = vpop.f32.mrf.mxu0  ;;  %v506_v19 = vpop.f32.mrf.mxu1  ;;  %v187_v38 = vsel %vm179_vm0, %v498_v15, 0.0  ;;  %v220_v52 = vsel %vm179_vm0, %v207_v42, 0.0 }
  0xe7   :  { %v209_v26 = vsel %vm179_vm0, %v201_v17, 0.0  ;;  %v204_v27 = vmul.f32 %v500_v16, %v500_v16  ;;  %v185_v33 = vsel %vm179_vm0, %v500_v16, 0.0  ;;  %v216_v43 = vsel %vm179_vm0, %v205_v34, 0.0 }
  0xe8   :  { %v504_v18 = vpop.f32.mrf.mxu0  ;;  %v522_v31 = vpop.f32.mrf.mxu1  ;;  %v208_v48 = vmul.f32 %v506_v19, %v506_v19  ;;  %v193_v53 = vsel %vm179_vm0, %v506_v19, 0.0  ;;  %v242_v17 = vlaneseq }
  0xe9   :  { %v181_v22 = vsel %vm179_vm0, %v504_v18, 0.0  ;;  %v202_v23 = vmul.f32 %v504_v18, %v504_v18  ;;  %v214_v37 = vsel %vm179_vm0, %v204_v27, 0.0  ;;  %v206_v39 = vmul.f32 %v522_v31, %v522_v31 }
  0xea   :  { %v182_v24 = vadd.f32 %v181_v22, %v180_v21  ;;  %v189_v44 = vsel %vm179_vm0, %v522_v31, 0.0  ;;  %v222_v56 = vsel %vm179_vm0, %v208_v48, 0.0  ;;  %v243_v20 = vshrl.u32 %v242_v17, 7  ;;  %v237_v21 = vld [vmem:[%s604_s2] sm:$0x1] }
  0xeb   :  { %v210_v28 = vsel %vm179_vm0, %v202_v23, 0.0  ;;  %v218_v49 = vsel %vm179_vm0, %v206_v39, 0.0 }
  0xec   :  { %v184_v29 = vadd.f32 %v183_v25, %v182_v24  ;;  %v211_v30 = vadd.f32 %v210_v28, %v209_v26  ;;  %v244_v22 = vsub.s32 0, %v243_v20  ;;  %v239_v25 = vld [vmem:[%s605_s3] sm:$0x1] }
  0xee   :  { %v213_v35 = vadd.f32 %v212_v32, %v211_v30  ;;  %v186_v36 = vadd.f32 %v185_v33, %v184_v29 }
  0xf0   :  { %v188_v40 = vadd.f32 %v187_v38, %v186_v36  ;;  %v215_v41 = vadd.f32 %v214_v37, %v213_v35 }
  0xf2   :  { %v190_v45 = vadd.f32 %v189_v44, %v188_v40  ;;  %v217_v46 = vadd.f32 %v216_v43, %v215_v41 }
  0xf4   :  { %v192_v50 = vadd.f32 %v191_v47, %v190_v45  ;;  %v219_v51 = vadd.f32 %v218_v49, %v217_v46 }
  0xf6   :  { %v194_v54 = vadd.f32 %v193_v53, %v192_v50  ;;  %v221_v55 = vadd.f32 %v220_v52, %v219_v51 }
  0xf8   :  { %v195_v57 = vrot.slane %v194_v54, 4  ;;  %v223_v58 = vadd.f32 %v222_v56, %v221_v55 }
  0xfa   :  { %v196_v59 = vadd.f32 %v195_v57, %v194_v54  ;;  %v224_v60 = vrot.slane %v223_v58, 4 }
  0xfc   :  { %v197_v61 = vrot.slane %v196_v59, 2  ;;  %v225_v62 = vadd.f32 %v224_v60, %v223_v58 }
  0xfe   :  { %v198_v63 = vadd.f32 %v197_v61, %v196_v59  ;;  %v226_v0 = vrot.slane %v225_v62, 2 }
 0x100   :  { %v199_v1 = vrot.slane %v198_v63, 1  ;;  %v227_v2 = vadd.f32 %v226_v0, %v225_v62 }
 0x102   :  { %v200_v3 = vadd.f32 %v199_v1, %v198_v63  ;;  %v228_v4 = vrot.slane %v227_v2, 1 }
 0x104   :  { %v229_v5 = vadd.f32 %v228_v4, %v227_v2  ;;  %v230_v6 = vmul.f32 0.015625, %v200_v3 }
 0x106   :  { %v231_v7 = vmul.f32 0.015625, %v229_v5  ;;  %v232_v8 = vmul.f32 %v230_v6, %v230_v6 }
 0x108   :  { %v233_v9 = vsub.f32 %v231_v7, %v232_v8 }
 0x10a   :  { %v234_v10 = vmax.f32 %v233_v9, 0.0 }
 0x10c   :  { %v235_v11 = vadd.f32 1e-05, %v234_v10 }
 0x10e   :  { %429 = vrsqrt.f32 %v235_v11 }
 0x11b   :  { %v430_v23 = vpop.eup %429 }
 0x11c   :  { %v238_v24 = vmul.f32 %v430_v23, %v237_v21 }
 0x11e   :  { %v240_v26 = vmul.f32 %v238_v24, %v230_v6  ;;  %v245_v27 = vrot.slane %v238_v24, %v244_v22 }
 0x120   :  { %v241_v28 = vsub.f32 %v239_v25, %v240_v26  ;;  %v246_v29 = vmul.f32 %v245_v27, %v496_v14  ;;  %v247_v30 = vmul.f32 %v245_v27, %v504_v18  ;;  %v248_v32 = vmul.f32 %v492_v12, %v245_v27 }
 0x121   :  { %v249_v33 = vmul.f32 %v500_v16, %v245_v27  ;;  %v250_v35 = vmul.f32 %v245_v27, %v498_v15  ;;  %v251_v36 = vmul.f32 %v245_v27, %v522_v31  ;;  %v252_v37 = vmul.f32 %v494_v13, %v245_v27 }
 0x122   :  { %v258_v34 = vrot.slane %v241_v28, %v244_v22  ;;  %v253_v38 = vmul.f32 %v506_v19, %v245_v27 }
 0x124   :  { %v260_v39 = vadd.f32 %v258_v34, %v246_v29  ;;  %v261_v40 = vadd.f32 %v258_v34, %v247_v30  ;;  %v262_v41 = vadd.f32 %v258_v34, %v248_v32  ;;  %v263_v14 = vadd.f32 %v258_v34, %v249_v33 }
 0x125   :  { %v264_v42 = vadd.f32 %v258_v34, %v250_v35  ;;  %v265_v18 = vadd.f32 %v258_v34, %v251_v36  ;;  %v266_v43 = vadd.f32 %v258_v34, %v252_v37  ;;  %v267_v12 = vadd.f32 %v258_v34, %v253_v38 }
 0x126   :  { %vm268_vm2 = vcmp.gt.f32.partialorder %v260_v39, 0.0  ;;  %vm269_vm3 = vcmp.gt.f32.partialorder %v261_v40, 0.0  ;;  %vm270_vm4 = vcmp.gt.f32.partialorder %v262_v41, 0.0  ;;  %vm271_vm5 = vcmp.gt.f32.partialorder %v263_v14, 0.0 }
 0x127   :  { %vm272_vm6 = vcmp.gt.f32.partialorder %v264_v42, 0.0  ;;  %vm273_vm7 = vcmp.gt.f32.partialorder %v265_v18, 0.0  ;;  %vm274_vm8 = vcmp.gt.f32.partialorder %v266_v43, 0.0  ;;  %vm275_vm9 = vcmp.gt.f32.partialorder %v267_v12, 0.0 }
 0x128   :  { %v276_v13 = vmul.f32 0.2, %v260_v39  ;;  %v277_v15 = vmul.f32 0.2, %v261_v40  ;;  %v278_v16 = vmul.f32 0.2, %v262_v41 }
 0x129   :  { %v279_v19 = vmul.f32 0.2, %v263_v14  ;;  %v280_v31 = vmul.f32 0.2, %v264_v42  ;;  %v281_v44 = vmul.f32 0.2, %v265_v18 }
 0x12a   :  { %v282_v45 = vmul.f32 0.2, %v266_v43  ;;  %v283_v46 = vmul.f32 0.2, %v267_v12  ;;  %v284_v47 = vsel %vm268_vm2, %v260_v39, %v276_v13  ;;  %v285_v48 = vsel %vm269_vm3, %v261_v40, %v277_v15 }
 0x12b   :  { %v286_v49 = vsel %vm270_vm4, %v262_v41, %v278_v16  ;;  %v287_v50 = vsel %vm271_vm5, %v263_v14, %v279_v19  ;;  %v288_v51 = vsel %vm272_vm6, %v264_v42, %v280_v31  ;;  %v289_v52 = vsel %vm273_vm7, %v265_v18, %v281_v44 }
 0x12c   :  { %v290_v53 = vsel %vm274_vm8, %v266_v43, %v282_v45  ;;  %v291_v54 = vsel %vm275_vm9, %v267_v12, %v283_v46  ;;  %v357_v55 = vpack.c.bf16 %v284_v47, %v284_v47  ;;  %v358_v56 = vpack.c.bf16 %v285_v48, %v285_v48 }
 0x12d   :  { %v359_v57 = vpack.c.bf16 %v286_v49, %v286_v49  ;;  %v360_v58 = vpack.c.bf16 %v287_v50, %v287_v50  ;;  %v361_v59 = vpack.c.bf16 %v288_v51, %v288_v51  ;;  %v362_v60 = vpack.c.bf16 %v289_v52, %v289_v52 }
 0x12e   :  { %v363_v61 = vpack.c.bf16 %v290_v53, %v290_v53  ;;  %v364_v62 = vpack.c.bf16 %v291_v54, %v291_v54  ;;  %325 = vst.msk [vmem:[%s606_s4] sm:$0xf] %vm324_vm1, %v357_v55  ;;  %326 = vst.msk [vmem:[%s606_s4 + $0x4] sm:$0xf] %vm324_vm1, %v358_v56 }
 0x12f   :  { %327 = vst.msk [vmem:[%s606_s4 + $0x8] sm:$0xf] %vm324_vm1, %v359_v57  ;;  %328 = vst.msk [vmem:[%s606_s4 + $0xc] sm:$0xf] %vm324_vm1, %v360_v58 }
 0x130   :  { %329 = vst.msk [vmem:[%s606_s4 + $0x10] sm:$0xf] %vm324_vm1, %v361_v59  ;;  %330 = vst.msk [vmem:[%s606_s4 + $0x14] sm:$0xf] %vm324_vm1, %v362_v60 }
 0x131   :  { %331 = vst.msk [vmem:[%s606_s4 + $0x18] sm:$0xf] %vm324_vm1, %v363_v61  ;;  %332 = vst.msk [vmem:[%s606_s4 + $0x1c] sm:$0xf] %vm324_vm1, %v364_v62 }

// kernel: encoder_forward.6
= control target key start
LH: loop header
LB: loop body
LE: loop exit
PB: predicated region body
PF: predicated region fallthrough
CT: control target
= control target key end

     0   :  { %vm199_vm0 = vcmask 261120   ;;  %v232_v50 = vlaneseq  ;;  %vm260_vm3 = vcmask 257024   ;;  %s423_s1 = inlined_call_operand.vmem [shape: bf16[256,32], index: 1, kind: input, shape index: {}]   ;;  %s424_s0 = inlined_call_operand.vmem [shape: bf16[16,256], index: 0, kind: input, shape index: {}]   ;;  %s425_s2 = inlined_call_operand.vmem [shape: f32[1,32], index: 2, kind: input, shape index: {}]   ;;  %s426_s3 = inlined_call_operand.vmem [shape: f32[1,32], index: 3, kind: input, shape index: {}]   ;;  %s427_s4 = inlined_call_operand.vmem [shape: bf16[16,32], index: 4, kind: output, shape index: {}]  }
   0x1   :  { %v311_v0 = vld [vmem:[%s423_s1 + $0x78] sm:$0xff]   ;;  %v313_v2 = vld [vmem:[%s423_s1 + $0x70] sm:$0xff]   ;;  %v315_v4 = vld [vmem:[%s423_s1 + $0x68] sm:$0xff]  }
   0x2   :  { %v312_v1 = vld [vmem:[%s423_s1 + $0x38] sm:$0xff]   ;;  %289 = vmatprep.subr.bf16.mxu0 %v311_v0  ;;  %v314_v3 = vld [vmem:[%s423_s1 + $0x30] sm:$0xff]   ;;  %v316_v5 = vld [vmem:[%s423_s1 + $0x28] sm:$0xff]   ;;  %v233_v51 = vshrl.u32 %v232_v50, 7 }
   0x3   :  { %290 = vmatpush3.bf16.msra.mxu0 %v312_v1  ;;  %v317_v6 = vld [vmem:[%s423_s1 + $0x60] sm:$0xff]   ;;  %v319_v8 = vld [vmem:[%s423_s1 + $0x58] sm:$0xff]   ;;  %v321_v10 = vld [vmem:[%s423_s1 + $0x50] sm:$0xff]  }
   0x4   :  { %291 = vmatprep.subr.bf16.mxu0 %v313_v2  ;;  %v318_v7 = vld [vmem:[%s423_s1 + $0x20] sm:$0xff]   ;;  %v320_v9 = vld [vmem:[%s423_s1 + $0x18] sm:$0xff]   ;;  %v322_v12 = vld [vmem:[%s423_s1 + $0x10] sm:$0xff]   ;;  %v234_v53 = vsub.s32 0, %v233_v51 }
   0x5   :  { %v329_v11 = vld [vmem:[%s424_s0 + $0x4] ss:$8 sps:$4 sm:$0xff]   ;;  %v327_v17 = vld [vmem:[%s424_s0] ss:$8 sps:$4 sm:$0xff]  }
   0x6   :  { %190 = vmatprep.mubr.bf16.mxu0 %v329_v11  ;;  %v323_v13 = vld [vmem:[%s423_s1 + $0x48] sm:$0xff]   ;;  %v325_v15 = vld [vmem:[%s423_s1 + $0x40] sm:$0xff]  }
   0x7   :  { %292 = vmatpush3.bf16.msra.mxu0 %v314_v3  ;;  %v324_v14 = vld [vmem:[%s423_s1 + $0x8] sm:$0xff]   ;;  %v326_v16 = vld [vmem:[%s423_s1] sm:$0xff]  }
   0x8   :  { %293 = vmatprep.subr.bf16.mxu0 %v315_v4  ;;  %v227_v52 = vld [vmem:[%s425_s2] sm:$0x1] }
   0x9   :  { %v229_v56 = vld [vmem:[%s426_s3] sm:$0x1] }
   0xb   :  { %294 = vmatpush3.bf16.msra.mxu0 %v316_v5 }
   0xc   :  { %295 = vmatprep.subr.bf16.mxu0 %v317_v6 }
   0xf   :  { %296 = vmatpush3.bf16.msra.mxu0 %v318_v7 }
  0x10   :  { %297 = vmatprep.subr.bf16.mxu0 %v319_v8 }
  0x13   :  { %298 = vmatpush3.bf16.msra.mxu0 %v320_v9 }
  0x14   :  { %299 = vmatprep.subr.bf16.mxu0 %v321_v10 }
  0x17   :  { %300 = vmatpush3.bf16.msra.mxu0 %v322_v12 }
  0x18   :  { %301 = vmatprep.subr.bf16.mxu0 %v323_v13 }
  0x1b   :  { %302 = vmatpush3.bf16.msra.mxu0 %v324_v14 }
  0x1c   :  { %303 = vmatprep.subr.bf16.mxu0 %v325_v15 }
  0x1f   :  { %304 = vmatpush3.bf16.msra.mxu0 %v326_v16 }
  0x22   :  { %191 = vmatmul.mubr.bf16.vlgmr.msra.gmra.mxu0 %v327_v17 }
  0xe2   :  { %v305_v18 = vpop.f32.mrf.mxu0 }
  0xe4   :  { %v306_v19 = vpop.f32.mrf.mxu0 }
  0xe5   :  { %v307_v20 = vadd.f32 %v306_v19, %v305_v18 }
  0xe6   :  { %v308_v21 = vpop.f32.mrf.mxu0 }
  0xe7   :  { %v209_v23 = vmul.f32 %v307_v20, %v307_v20  ;;  %v200_v25 = vsel %vm199_vm0, %v307_v20, 0.0 }
  0xe8   :  { %v309_v22 = vpop.f32.mrf.mxu0 }
  0xe9   :  { %v310_v24 = vadd.f32 %v309_v22, %v308_v21  ;;  %v211_v29 = vsel %vm199_vm0, %v209_v23, 0.0 }
  0xeb   :  { %v201_v26 = vsel %vm199_vm0, %v310_v24, 0.0  ;;  %v210_v27 = vmul.f32 %v310_v24, %v310_v24 }
  0xec   :  { %v202_v28 = vadd.f32 %v201_v26, %v200_v25 }
  0xed   :  { %v212_v30 = vsel %vm199_vm0, %v210_v27, 0.0 }
  0xee   :  { %v203_v31 = vrot.slane %v202_v28, 4  ;;  %v213_v32 = vadd.f32 %v212_v30, %v211_v29 }
  0xf0   :  { %v204_v33 = vadd.f32 %v203_v31, %v202_v28  ;;  %v214_v34 = vrot.slane %v213_v32, 4 }
  0xf2   :  { %v205_v35 = vrot.slane %v204_v33, 2  ;;  %v215_v36 = vadd.f32 %v214_v34, %v213_v32 }
  0xf4   :  { %v206_v37 = vadd.f32 %v205_v35, %v204_v33  ;;  %v216_v38 = vrot.slane %v215_v36, 2 }
  0xf6   :  { %v207_v39 = vrot.slane %v206_v37, 1  ;;  %v217_v40 = vadd.f32 %v216_v38, %v215_v36 }
  0xf8   :  { %v208_v41 = vadd.f32 %v207_v39, %v206_v37  ;;  %v218_v42 = vrot.slane %v217_v40, 1 }
  0xfa   :  { %v219_v43 = vadd.f32 %v218_v42, %v217_v40  ;;  %v220_v44 = vmul.f32 0.0625, %v208_v41 }
  0xfc   :  { %v221_v45 = vmul.f32 0.0625, %v219_v43  ;;  %v222_v46 = vmul.f32 %v220_v44, %v220_v44 }
  0xfe   :  { %v223_v47 = vsub.f32 %v221_v45, %v222_v46 }
 0x100   :  { %v224_v48 = vmax.f32 %v223_v47, 0.0 }
 0x102   :  { %v225_v49 = vadd.f32 1e-05, %v224_v48 }
 0x104   :  { %330 = vrsqrt.f32 %v225_v49 }
 0x111   :  { %v331_v54 = vpop.eup %330 }
 0x112   :  { %v228_v55 = vmul.f32 %v331_v54, %v227_v52 }
 0x114   :  { %v230_v57 = vmul.f32 %v228_v55, %v220_v44  ;;  %v235_v58 = vrot.slane %v228_v55, %v234_v53 }
 0x116   :  { %v231_v59 = vsub.f32 %v229_v56, %v230_v57  ;;  %v236_v60 = vmul.f32 %v307_v20, %v235_v58  ;;  %v237_v61 = vmul.f32 %v310_v24, %v235_v58 }
 0x118   :  { %v242_v62 = vrot.slane %v231_v59, %v234_v53 }
 0x11a   :  { %v244_v63 = vadd.f32 %v242_v62, %v236_v60  ;;  %v245_v0 = vadd.f32 %v242_v62, %v237_v61 }
 0x11c   :  { %vm246_vm1 = vcmp.gt.f32.partialorder %v244_v63, 0.0  ;;  %vm247_vm2 = vcmp.gt.f32.partialorder %v245_v0, 0.0  ;;  %v248_v1 = vmul.f32 0.2, %v244_v63  ;;  %v249_v2 = vmul.f32 0.2, %v245_v0 }
 0x11e   :  { %v250_v3 = vsel %vm246_vm1, %v244_v63, %v248_v1  ;;  %v251_v4 = vsel %vm247_vm2, %v245_v0, %v249_v2 }
 0x11f   :  { %v287_v5 = vpack.c.bf16 %v250_v3, %v250_v3  ;;  %v288_v6 = vpack.c.bf16 %v251_v4, %v251_v4 }
 0x121   :  { %261 = vst.msk [vmem:[%s427_s4] sm:$0xf] %vm260_vm3, %v287_v5  ;;  %262 = vst.msk [vmem:[%s427_s4 + $0x4] sm:$0xf] %vm260_vm3, %v288_v6 }

// kernel: encoder_forward.7
= control target key start
LH: loop header
LB: loop body
LE: loop exit
PB: predicated region body
PF: predicated region fallthrough
CT: control target
= control target key end

     0   :  { %v95_v29 = vlaneseq  ;;  %v691_v35 = vmov 1983009808   ;;  %s857_s0 = inlined_call_operand.vmem [shape: bf16[4,512], index: 0, kind: input, shape index: {}]   ;;  %s858_s1 = inlined_call_operand.vmem [shape: bf16[512,64], index: 1, kind: input, shape index: {}]   ;;  %s859_s2 = inlined_call_operand.vmem [shape: f32[1,64], index: 2, kind: input, shape index: {}]   ;;  %s860_s3 = inlined_call_operand.vmem [shape: f32[1,64], index: 3, kind: input, shape index: {}]   ;;  %s861_s4 = inlined_call_operand.vmem [shape: bf16[64,10], index: 4, kind: input, shape index: {}]   ;;  %s862_s5 = inlined_call_operand.vmem [shape: f32[1,10], index: 5, kind: input, shape index: {}]   ;;  %s863_s6 = inlined_call_operand.hbm [shape: f32[4,10], index: 6, kind: output, shape index: {}]  }
   0x1   :  { %v630_v0 = vld [vmem:[%s858_s1 + $0x78] sm:$0xff]   ;;  %v634_v4 = vld [vmem:[%s858_s1 + $0x70] sm:$0xff]   ;;  %v638_v8 = vld [vmem:[%s858_s1 + $0x68] sm:$0xff]   ;;  %v93_v36 = vunpack.c.l.s4 %v691_v35 }
   0x2   :  { %v631_v1 = vld [vmem:[%s858_s1 + $0xf8] sm:$0xff]   ;;  %565 = vmatprep.subr.bf16.mxu0 %v630_v0  ;;  %v635_v5 = vld [vmem:[%s858_s1 + $0xf0] sm:$0xff]   ;;  %v639_v9 = vld [vmem:[%s858_s1 + $0xe8] sm:$0xff]   ;;  %v829_v34 = vshrl.u32 %v95_v29, 7 }
   0x3   :  { %v632_v2 = vld [vmem:[%s858_s1 + $0x38] sm:$0xff]   ;;  %587 = vmatprep.subr.bf16.mxu1 %v631_v1  ;;  %v636_v6 = vld [vmem:[%s858_s1 + $0x30] sm:$0xff]   ;;  %v640_v10 = vld [vmem:[%s858_s1 + $0x28] sm:$0xff]   ;;  %v94_v37 = vunpack.c.0.s8 %v93_v36 }
   0x4   :  { %v633_v3 = vld [vmem:[%s858_s1 + $0xb8] sm:$0xff]   ;;  %566 = vmatpush3.bf16.msra.mxu0 %v632_v2  ;;  %v637_v7 = vld [vmem:[%s858_s1 + $0xb0] sm:$0xff]   ;;  %v641_v11 = vld [vmem:[%s858_s1 + $0xa8] sm:$0xff]  }
   0x5   :  { %588 = vmatpush3.bf16.msra.mxu1 %v633_v3  ;;  %567 = vmatprep.subr.bf16.mxu0 %v634_v4  ;;  %v642_v12 = vld [vmem:[%s858_s1 + $0x60] sm:$0xff]   ;;  %v646_v16 = vld [vmem:[%s858_s1 + $0x58] sm:$0xff]   ;;  %v650_v20 = vld [vmem:[%s858_s1 + $0x50] sm:$0xff]  }
   0x6   :  { %589 = vmatprep.subr.bf16.mxu1 %v635_v5  ;;  %v643_v13 = vld [vmem:[%s858_s1 + $0xe0] sm:$0xff]   ;;  %v647_v17 = vld [vmem:[%s858_s1 + $0xd8] sm:$0xff]   ;;  %v651_v21 = vld [vmem:[%s858_s1 + $0xd0] sm:$0xff]  }
   0x7   :  { %v644_v14 = vld [vmem:[%s858_s1 + $0x20] sm:$0xff]   ;;  %v648_v18 = vld [vmem:[%s858_s1 + $0x18] sm:$0xff]   ;;  %v652_v22 = vld [vmem:[%s858_s1 + $0x10] sm:$0xff]  }
   0x8   :  { %568 = vmatpush3.bf16.msra.mxu0 %v636_v6  ;;  %v645_v15 = vld [vmem:[%s858_s1 + $0xa0] sm:$0xff]   ;;  %v649_v19 = vld [vmem:[%s858_s1 + $0x98] sm:$0xff]   ;;  %v653_v23 = vld [vmem:[%s858_s1 + $0x90] sm:$0xff]  }
   0x9   :  { %590 = vmatpush3.bf16.msra.mxu1 %v637_v7  ;;  %569 = vmatprep.subr.bf16.mxu0 %v638_v8  ;;  %v654_v24 = vld [vmem:[%s858_s1 + $0x48] sm:$0xff]   ;;  %v658_v28 = vld [vmem:[%s858_s1 + $0x40] sm:$0xff]  }
   0xa   :  { %591 = vmatprep.subr.bf16.mxu1 %v639_v9  ;;  %v655_v25 = vld [vmem:[%s858_s1 + $0xc8] sm:$0xff]   ;;  %v659_v30 = vld [vmem:[%s858_s1 + $0xc0] sm:$0xff]  }
   0xb   :  { %v656_v26 = vld [vmem:[%s858_s1 + $0x8] sm:$0xff]   ;;  %v660_v31 = vld [vmem:[%s858_s1] sm:$0xff]  }
   0xc   :  { %570 = vmatpush3.bf16.msra.mxu0 %v640_v10  ;;  %v657_v27 = vld [vmem:[%s858_s1 + $0x88] sm:$0xff]   ;;  %v661_v32 = vld [vmem:[%s858_s1 + $0x80] sm:$0xff]  }
   0xd   :  { %592 = vmatpush3.bf16.msra.mxu1 %v641_v11  ;;  %571 = vmatprep.subr.bf16.mxu0 %v642_v12  ;;  %v25_v33 = vld [vmem:[%s857_s0] sm:$0xff] }
   0xe   :  { %593 = vmatprep.subr.bf16.mxu1 %v643_v13  ;;  %v91_v38 = vcombine.high %v25_v33, %v25_v33 }
  0x10   :  { %572 = vmatpush3.bf16.msra.mxu0 %v644_v14 }
  0x11   :  { %594 = vmatpush3.bf16.msra.mxu1 %v645_v15  ;;  %573 = vmatprep.subr.bf16.mxu0 %v646_v16 }
  0x12   :  { %595 = vmatprep.subr.bf16.mxu1 %v647_v17 }
  0x14   :  { %574 = vmatpush3.bf16.msra.mxu0 %v648_v18 }
  0x15   :  { %596 = vmatpush3.bf16.msra.mxu1 %v649_v19  ;;  %575 = vmatprep.subr.bf16.mxu0 %v650_v20 }
  0x16   :  { %597 = vmatprep.subr.bf16.mxu1 %v651_v21 }
  0x18   :  { %576 = vmatpush3.bf16.msra.mxu0 %v652_v22 }
  0x19   :  { %598 = vmatpush3.bf16.msra.mxu1 %v653_v23  ;;  %577 = vmatprep.subr.bf16.mxu0 %v654_v24 }
  0x1a   :  { %599 = vmatprep.subr.bf16.mxu1 %v655_v25 }
  0x1c   :  { %578 = vmatpush3.bf16.msra.mxu0 %v656_v26 }
  0x1d   :  { %600 = vmatpush3.bf16.msra.mxu1 %v657_v27  ;;  %579 = vmatprep.subr.bf16.mxu0 %v658_v28 }
  0x1e   :  { %601 = vmatprep.subr.bf16.mxu1 %v659_v30 }
  0x20   :  { %580 = vmatpush3.bf16.msra.mxu0 %v660_v31 }
  0x21   :  { %602 = vmatpush3.bf16.msra.mxu1 %v661_v32 }
  0x22   :  { %11 = vsyncpa [#allocation3], 0  ;;  %v97_v39 = vsub.s32 %v94_v37, %v829_v34  ;;  %v663_v44 = vld [vmem:[%s861_s4 + $0x18] sm:$0xff]   ;;  %v692_v45 = vmov 0.0   ;;  %v664_v46 = vld [vmem:[%s861_s4 + $0x10] sm:$0xff]   ;;  %vm693_vm0 = vmmov 0  }
  0x23   :  { %614 = vmatprep.subr.bf16.mxu0 %v692_v45  ;;  %v665_v47 = vld [vmem:[%s861_s4 + $0x8] sm:$0xff]   ;;  %v666_v48 = vld [vmem:[%s861_s4] sm:$0xff]   ;;  %vm384_vm1 = vcmask 519168   ;;  %v414_v18 = vsub.s32 0, %v829_v34  ;;  %vm467_vm3 = vcmask 523264   ;;  %s694_s25 = smov [#allocation2]  }
  0x24   :  { %v98_v40 = vrot.slane %v25_v33, %v97_v39  ;;  %v105_v41 = vrot.slane %v91_v38, %v97_v39  ;;  %v407_v17 = vld [vmem:[%s859_s2] sm:$0x1]  ;;  %s519_s26 = sshll.u32 %s694_s25, 4  ;;  %vm511_vm4 = vcmask 76800   ;;  %s520_s26 = int_to_ptr.vmem [resolvable:$true] %s519_s26 }
  0x25   :  { %v409_v21 = vld [vmem:[%s860_s3] sm:$0x1]  ;;  %s669_s3 = scalar_lea.vmem %s520_s26, 64  ;;  %p674_p1 = scmp.lt.s32.totalorder %s520_s26, %s520_s26 }
  0x26   :  { %v106_v42 = vcombine.high %v98_v40, %v98_v40  ;;  %v107_v43 = vcombine.high %v105_v41, %v105_v41  ;;  %v559_v31 = vld [vmem:[%s862_s5] ss:$0 sm:$0xff]  ;;  %p670_p0 = scmp.ne.s32.totalorder %s520_s26, %s669_s3  ;;  %p675_p2 = scmp.lt.s32.totalorder %s669_s3, %s669_s3 }
  0x28   :  { %336 = vmatprep.mubr.bf16.mxu0 %v106_v42  ;;  %376 = vmatprep.mubr.bf16.mxu1 %v107_v43  ;;  %p676_p3 = por %p675_p2, %p674_p1 }
  0x29   :  { %337 = vmatmul.mubr.bf16.vlgmr.msra.gmra.mxu0 %v98_v40  ;;  %377 = vmatmul.mubr.bf16.vlgmr.msra.gmra.mxu1 %v105_v41 }
  0x2a   :  { %615 = vmatpush3.bf16.msra.mxu0 %v663_v44  ;;  %622 = vmatprep.mubr.msk.bf16.mxu0 %vm693_vm0, %v692_v45  ;;  %p677_p4 = pnand %p676_p3, %p670_p0 }
  0x2b   :  { %616 = vmatprep.subr.bf16.mxu0 %v692_v45 }
  0x2e   :  { %617 = vmatpush3.bf16.msra.mxu0 %v664_v46 }
  0x2f   :  { %618 = vmatprep.subr.bf16.mxu0 %v692_v45 }
  0x32   :  { %619 = vmatpush3.bf16.msra.mxu0 %v665_v47 }
  0x33   :  { %620 = vmatprep.subr.bf16.mxu0 %v692_v45 }
  0x36   :  { %621 = vmatpush3.bf16.msra.mxu0 %v666_v48 }
  0xe9   :  { %v581_v49 = vpop.f32.mrf.mxu0  ;;  %v603_v50 = vpop.f32.mrf.mxu1 }
  0xeb   :  { %v582_v51 = vpop.f32.mrf.mxu0  ;;  %v604_v52 = vpop.f32.mrf.mxu1 }
  0xec   :  { %v583_v53 = vadd.f32 %v582_v51, %v581_v49  ;;  %v605_v54 = vadd.f32 %v604_v52, %v603_v50 }
  0xed   :  { %v584_v55 = vpop.f32.mrf.mxu0  ;;  %v606_v56 = vpop.f32.mrf.mxu1 }
  0xee   :  { %v379_v57 = vadd.f32 %v605_v54, %v583_v53 }
  0xef   :  { %v585_v58 = vpop.f32.mrf.mxu0  ;;  %v607_v59 = vpop.f32.mrf.mxu1 }
  0xf0   :  { %v385_v60 = vsel %vm384_vm1, %v379_v57, 0.0  ;;  %v392_v61 = vmul.f32 %v379_v57, %v379_v57 }
  0xf1   :  { %v386_v62 = vrot.slane %v385_v60, 4 }
  0xf2   :  { %v393_v63 = vsel %vm384_vm1, %v392_v61, 0.0 }
  0xf3   :  { %v387_v0 = vadd.f32 %v386_v62, %v385_v60  ;;  %v394_v1 = vrot.slane %v393_v63, 4 }
  0xf5   :  { %v388_v2 = vrot.slane %v387_v0, 2  ;;  %v395_v3 = vadd.f32 %v394_v1, %v393_v63 }
  0xf7   :  { %v389_v4 = vadd.f32 %v388_v2, %v387_v0  ;;  %v396_v5 = vrot.slane %v395_v3, 2 }
  0xf9   :  { %v390_v6 = vrot.slane %v389_v4, 1  ;;  %v397_v7 = vadd.f32 %v396_v5, %v395_v3 }
  0xfb   :  { %v391_v8 = vadd.f32 %v390_v6, %v389_v4  ;;  %v398_v9 = vrot.slane %v397_v7, 1 }
  0xfd   :  { %v399_v10 = vadd.f32 %v398_v9, %v397_v7  ;;  %v400_v11 = vmul.f32 0.25, %v391_v8 }
  0xff   :  { %v401_v12 = vmul.f32 0.25, %v399_v10  ;;  %v402_v13 = vmul.f32 %v400_v11, %v400_v11 }
 0x101   :  { %v403_v14 = vsub.f32 %v401_v12, %v402_v13 }
 0x103   :  { %v404_v15 = vmax.f32 %v403_v14, 0.0 }
 0x105   :  { %v405_v16 = vadd.f32 1e-05, %v404_v15 }
 0x107   :  { %667 = vrsqrt.f32 %v405_v16 }
 0x114   :  { %v668_v19 = vpop.eup %667 }
 0x115   :  { %v408_v20 = vmul.f32 %v668_v19, %v407_v17 }
 0x117   :  { %v410_v22 = vmul.f32 %v408_v20, %v400_v11  ;;  %v415_v23 = vrot.slane %v408_v20, %v414_v18 }
 0x119   :  { %v411_v24 = vsub.f32 %v409_v21, %v410_v22  ;;  %v416_v25 = vmul.f32 %v415_v23, %v379_v57 }
 0x11b   :  { %v421_v26 = vrot.slane %v411_v24, %v414_v18 }
 0x11d   :  { %v423_v27 = vadd.f32 %v421_v26, %v416_v25 }
 0x11f   :  { %vm424_vm2 = vcmp.gt.f32.partialorder %v423_v27, 0.0  ;;  %v425_v28 = vmul.f32 0.2, %v423_v27 }
 0x121   :  { %v426_v29 = vsel %vm424_vm2, %v423_v27, %v425_v28 }
 0x122   :  { %v427_v30 = vpack.c.bf16 %v426_v29, %v426_v29 }
 0x124   :  { %623 = vmatmul.mubr.msk.bf16.vlgmr.msra.gmra.mxu0 %vm467_vm3, %v427_v30 }
 0x1e4   :  { %v505_v32 = vpop.f32.mrf.mxu0 }
 0x1e5   :  { %v506_v33 = vadd.f32 %v559_v31, %v505_v32 }
 0x1e6   :  { %v624_v34 = vpop.f32.mrf.mxu0 }
 0x1e7   :  { %512 = vst.msk [vmem:[#allocation2] sm:$0xf] %vm511_vm4, %v506_v33 }
 0x1e8   :  { %v508_v35 = vpop.f32.mrf.mxu0 }
 0x1e9   :  { %680 = shalt.err (!%p677_p4)
}
 0x1ea   :  { %522 = dma.vmem_to_hbm [thread:$0]  %s520_s26, 64, %s863_s6, [#allocation3]   ;;  %v625_v36 = vpop.f32.mrf.mxu0 }
 0x1eb   :  { %689 = dma.done.wait [#allocation3], 64  }
 0x1ec   :  { %690 = vsyncadd [#allocation3], 4294967232 }
 0x1ed   :  { %526 = vsyncpa [#allocation3], 1 }

</bundles_post_ra>
